<compile_context>
chip_gen: v6e
topology: v6e:2x2x1
jax: 0.10.0
libtpu: 0.0.40
codegen_flags: <defaults>
</compile_context>

<pallas_src>
import functools

import jax
import jax.numpy as jnp
import numpy as np
from jax import lax
from jax.experimental import pallas as pl
from jax.experimental.pallas import tpu as pltpu


def _ceil_to(n, m):
    return -(-n // m) * m


def _tile_bytes(major, sub, lane, itemsize):
    """VMEM bytes of a (major, sub, lane) block after (sublane, lane) padding."""
    sub_tile = 8 * max(1, 4 // itemsize)          # 8 rows f32, 16 rows bf16
    return major * _ceil_to(max(sub, 1), sub_tile) * _ceil_to(max(lane, 1), 128) * itemsize


def _be_conv_kernel(x_ref, w_ref, b_ref, o_ref, *, K, Ho):
    # x_ref: (Hp, Bt, f_inp)   H-major padded input rows; lane dim = (wp, ci) (+ zero pad)
    # w_ref: (K*f_inp, ft)     banded per-ensemble weights (r/s folded in)
    # b_ref: (1, ft)           per-ensemble bias tiled over W (f32, zeros if none)
    # o_ref: (Ho, Bt, ft)      lane-dense output block
    Bt = x_ref.shape[1]
    f_inp = x_ref.shape[2]
    ft = o_ref.shape[-1]

    # Fused im2col over kh: each piece is a major-axis slice (pure address
    # offset, no copy); f_inp is a multiple of 128 so the lane-dim concat is
    # aligned vreg placement.  One deep matmul instead of K shallow ones.
    if K > 1:
        lhs = jnp.concatenate([x_ref[kh:kh + Ho] for kh in range(K)], axis=-1)
    else:
        lhs = x_ref[0:Ho]
    lhs = lhs.reshape(Ho * Bt, K * f_inp)

    acc = jnp.dot(lhs, w_ref[...], preferred_element_type=jnp.float32)
    y = acc + b_ref[...]                           # (1, ft) broadcast bias, f32
    o_ref[...] = y.reshape(Ho, Bt, ft).astype(o_ref.dtype)


def conv2d_batch_ensemble(x, weight, r_factor, s_factor, bias, *,
                          ensemble_size, padding, compute_dtype=jnp.bfloat16):
    """Training-mode forward of Conv2DBatchEnsemble.

    x: (N, Cin, H, W) NCHW with N = ensemble_size * batch.
    weight: (Cout, Cin, K, K) PyTorch OIHW (stride=1, dilation=1, groups=1).
    r_factor: (E, Cin); s_factor: (E, Cout); bias: (E, Cout) or None.
    compute_dtype: dtype fed to the MXU (accumulation is always f32).
    """
    N, Cin, H, W = x.shape
    Cout, _, K, _ = weight.shape
    E = ensemble_size
    B = N // E
    Hp, Wp = H + 2 * padding, W + 2 * padding
    Ho, Wo = Hp - K + 1, Wp - K + 1
    f_in, f_out = Wp * Cin, Wo * Cout
    f_inp = _ceil_to(f_in, 128)       # lane-align so each kh slice is tile-aligned
    cbytes = jnp.dtype(compute_dtype).itemsize
    obytes = jnp.dtype(x.dtype).itemsize

    # ---- weight prep (once per call): fold r/s, build Toeplitz-over-W band ---
    # conv is linear, so the r (input-channel) and s (output-channel)
    # BatchEnsemble factors fold into per-ensemble weights.
    w_kkio = jnp.transpose(weight, (2, 3, 1, 0)).astype(jnp.float32)       # (K,K,Cin,Cout)
    w_fold = (w_kkio[None]
              * r_factor[:, None, None, :, None].astype(jnp.float32)
              * s_factor[:, None, None, None, :].astype(jnp.float32))      # (E,K,K,Cin,Cout)
    #   band[e, kh, wp*Cin+ci, wo*Cout+co] = w_fold[e, kh, wp-wo, ci, co] if 0<=wp-wo<K
    # TODO(synk): for large W*C this band inflates weight bytes / MXU flops by
    # ~Wp/K; switch to a channel-tiled im2col kernel in that regime.
    wp_idx = jnp.arange(Wp)[:, None]
    wo_idx = jnp.arange(Wo)[None, :]
    kw = wp_idx - wo_idx                                                    # (Wp, Wo)
    valid = ((kw >= 0) & (kw < K)).astype(jnp.float32)
    band = w_fold[:, :, jnp.clip(kw, 0, K - 1), :, :]                       # (E,K,Wp,Wo,Cin,Cout)
    band = band * valid[None, None, :, :, None, None]
    band = band.transpose(0, 1, 2, 4, 3, 5).reshape(E, K, f_in, f_out)
    band = jnp.pad(band, ((0, 0), (0, 0), (0, f_inp - f_in), (0, 0)))       # zero rows for lane pad
    band = band.reshape(E, K * f_inp, f_out).astype(compute_dtype)

    if bias is None:
        bias = jnp.zeros((E, Cout), jnp.float32)
    b_lane = jnp.tile(bias.astype(jnp.float32), (1, Wo)).reshape(E, 1, f_out)

    # ---- input prep: NCHW -> H-major (E, Hp, B, f_inp), lane-dim zero pad ----
    # TODO(synk): if the surrounding model keeps NHWC activations these
    # interface transposes (and the final one) disappear entirely.
    x_nhwc = jnp.transpose(x, (0, 2, 3, 1))
    x_p = jnp.pad(x_nhwc, ((0, 0), (padding, padding), (padding, padding), (0, 0)))
    x_blk = x_p.reshape(E, B, Hp, f_in)
    x_blk = jnp.pad(x_blk, ((0, 0), (0, 0), (0, 0), (0, f_inp - f_in)))
    x_blk = jnp.transpose(x_blk, (0, 2, 1, 3)).astype(compute_dtype)        # (E, Hp, B, f_inp)

    # ---- f_out tile: cap band/output lane width (matters on v7x's 64 MiB) ----
    if f_out > 512 and f_out % 128 == 0:
        ft = 128
        for cand in range(512, 127, -128):
            if f_out % cand == 0:
                ft = cand
                break
    else:
        ft = f_out
    n_ft = f_out // ft

    # ---- Bt: largest batch tile that fits a generation-aware VMEM budget -----
    try:
        vmem_cap = int(getattr(pltpu.get_tpu_info(), "vmem_capacity_bytes", 64 << 20))
    except Exception:
        vmem_cap = 64 << 20                                   # v7x-safe fallback
    budget = int(0.45 * vmem_cap)

    fixed = (2 * _tile_bytes(1, K * f_inp, ft, cbytes)        # band (double-buffered)
             + 2 * _tile_bytes(1, 1, ft, 4))                  # bias

    def vmem_usage(bt):
        return (fixed
                + 2 * _tile_bytes(Hp, bt, f_inp, cbytes)      # x block, double-buffered
                + 2 * _tile_bytes(Ho, bt, ft, obytes)         # out block, double-buffered
                + _tile_bytes(1, Ho * bt, K * f_inp, cbytes)  # fused lhs
                + _tile_bytes(1, Ho * bt, ft, 4))             # f32 accumulator

    candidates = [b for b in range(B, 0, -1) if B % b == 0 and (b == B or b % 8 == 0)]
    Bt = next((b for b in candidates if vmem_usage(b) <= budget), min(candidates))
    # v7x megacore: keep a few grid steps so both TensorCores get work to pipeline.
    while E * (B // Bt) * n_ft < 4 and Bt % 16 == 0:
        Bt //= 2
    vmem_limit = int(min(max(32 << 20, 0.75 * vmem_cap), 100 << 20))

    kernel = functools.partial(_be_conv_kernel, K=K, Ho=Ho)
    out = pl.pallas_call(
        kernel,
        out_shape=jax.ShapeDtypeStruct((E, Ho, B, f_out), x.dtype),
        grid=(E, B // Bt, n_ft),
        in_specs=[
            pl.BlockSpec((None, Hp, Bt, f_inp), lambda e, b, j: (e, 0, b, 0)),
            pl.BlockSpec((None, K * f_inp, ft), lambda e, b, j: (e, 0, j)),
            pl.BlockSpec((None, 1, ft), lambda e, b, j: (e, 0, j)),
        ],
        out_specs=pl.BlockSpec((None, Ho, Bt, ft), lambda e, b, j: (e, 0, b, j)),
        compiler_params=pltpu.CompilerParams(
            dimension_semantics=("parallel", "parallel", "arbitrary"),
            vmem_limit_bytes=vmem_limit),
    )(x_blk, band, b_lane)

    # (E, Ho, B, Wo*Cout) -> (N, Cout, Ho, Wo)
    out = out.reshape(E, Ho, B, Wo, Cout)
    return jnp.transpose(out, (0, 2, 4, 1, 3)).reshape(N, Cout, Ho, Wo)


def reference(x, weight, r_factor, s_factor, bias, *, ensemble_size, padding):
    """Plain-JAX port of the PyTorch forward (inference=False branch)."""
    N, Cin, H, W = x.shape
    E, B = ensemble_size, N // ensemble_size
    rx = x.reshape(E, B, Cin, H, W) * r_factor[:, None, :, None, None]
    rx = rx.reshape(N, Cin, H, W)
    wrx = lax.conv_general_dilated(
        rx, weight, window_strides=(1, 1),
        padding=[(padding, padding), (padding, padding)],
        dimension_numbers=("NCHW", "OIHW", "NCHW"))
    Cout, Ho, Wo = wrx.shape[1], wrx.shape[2], wrx.shape[3]
    y = wrx.reshape(E, B, Cout, Ho, Wo) * s_factor[:, None, :, None, None]
    if bias is not None:
        y = y + bias[:, None, :, None, None]
    return y.reshape(N, Cout, Ho, Wo)


if __name__ == "__main__":
    # Module config (small): ensemble_size=2, batch-per-member=2, Cin=4,
    # Cout=8, kernel_size=3, padding=1, spatial 16x16.
    E, B, Cin, Cout, K, P, H, W = 2, 2, 4, 8, 3, 1, 16, 16
    N = E * B

    key = jax.random.PRNGKey(0)
    k_w, k_x, k_r, k_s, k_b = jax.random.split(key, 5)

    # reset_parameters(): conv.weight ~ N(mean=1.0, std=0.1); r = s = 1; bias = 0.
    weight = 1.0 + 0.1 * jax.random.normal(k_w, (Cout, Cin, K, K), jnp.float32)
    x = jax.random.normal(k_x, (N, Cin, H, W), jnp.float32)

    # (a) default init, bias_is=False — f32 compute path, tight tolerance
    #     (validates the Toeplitz band indexing / H-major layout exactly).
    r1 = jnp.ones((E, Cin), jnp.float32)
    s1 = jnp.ones((E, Cout), jnp.float32)
    out = jax.block_until_ready(conv2d_batch_ensemble(
        x, weight, r1, s1, None, ensemble_size=E, padding=P,
        compute_dtype=jnp.float32))
    ref = reference(x, weight, r1, s1, None, ensemble_size=E, padding=P)
    np.testing.assert_allclose(np.asarray(out), np.asarray(ref),
                               rtol=5e-4, atol=5e-4)

    # (b) trained-like parameters, bias_is=True — default bf16 compute path
    #     (f32 accumulation), looser tolerance for the bf16 input rounding.
    r = 1.0 + 0.1 * jax.random.normal(k_r, (E, Cin), jnp.float32)
    s = 1.0 + 0.1 * jax.random.normal(k_s, (E, Cout), jnp.float32)
    b = 0.1 * jax.random.normal(k_b, (E, Cout), jnp.float32)
    out2 = jax.block_until_ready(conv2d_batch_ensemble(
        x, weight, r, s, b, ensemble_size=E, padding=P))
    ref2 = reference(x, weight, r, s, b, ensemble_size=E, padding=P)
    np.testing.assert_allclose(np.asarray(out2), np.asarray(ref2),
                               rtol=3e-2, atol=1.5e-1)

    # TODO(synk): inference=True branch (plain conv + shared bias) is the
    # r=s=1 / single-bias-row special case of this kernel; not exercised here.
    print("KERNEL_OK")
</pallas_src>

<mosaic_0001>
module attributes {stable_mosaic.version = 11 : i64} {
  func.func @_be_conv_kernel(%arg0: i32, %arg1: i32, %arg2: i32, %arg3: memref<1x18x2x128xf32, #tpu.memory_space<vmem>>, %arg4: memref<1x384x128xf32, #tpu.memory_space<vmem>>, %arg5: memref<1x1x128xf32, #tpu.memory_space<vmem>>, %arg6: memref<1x16x2x128xf32, #tpu.memory_space<vmem>>) attributes {dimension_semantics = [#tpu.dimension_semantics<parallel>, #tpu.dimension_semantics<parallel>, #tpu.dimension_semantics<arbitrary>], iteration_bounds = array<i64: 2, 1, 1>, scalar_prefetch = 0 : i64, scratch_operands = 0 : i64, tpu.core_type = #tpu.core_type<tc>, window_params = [{transform_indices = @transform_0, window_bounds = array<i64: 1, 18, 2, 128>}, {transform_indices = @transform_1, window_bounds = array<i64: 1, 384, 128>}, {transform_indices = @transform_2, window_bounds = array<i64: 1, 1, 128>}, {transform_indices = @transform_3, window_bounds = array<i64: 1, 16, 2, 128>}]} {
    %c0 = arith.constant 0 : index
    %c0_0 = arith.constant 0 : index
    %c0_1 = arith.constant 0 : index
    %c0_2 = arith.constant 0 : index
    %0 = vector.load %arg3[%c0, %c0_0, %c0_1, %c0_2] : memref<1x18x2x128xf32, #tpu.memory_space<vmem>>, vector<1x16x2x128xf32>
    %1 = vector.shape_cast %0 : vector<1x16x2x128xf32> to vector<16x2x128xf32>
    %c0_3 = arith.constant 0 : index
    %c1 = arith.constant 1 : index
    %c0_4 = arith.constant 0 : index
    %c0_5 = arith.constant 0 : index
    %2 = vector.load %arg3[%c0_3, %c1, %c0_4, %c0_5] : memref<1x18x2x128xf32, #tpu.memory_space<vmem>>, vector<1x16x2x128xf32>
    %3 = vector.shape_cast %2 : vector<1x16x2x128xf32> to vector<16x2x128xf32>
    %c0_6 = arith.constant 0 : index
    %c2 = arith.constant 2 : index
    %c0_7 = arith.constant 0 : index
    %c0_8 = arith.constant 0 : index
    %4 = vector.load %arg3[%c0_6, %c2, %c0_7, %c0_8] : memref<1x18x2x128xf32, #tpu.memory_space<vmem>>, vector<1x16x2x128xf32>
    %5 = vector.shape_cast %4 : vector<1x16x2x128xf32> to vector<16x2x128xf32>
    %6 = tpu.concatenate %1, %3, %5 in 2 : vector<16x2x128xf32>, vector<16x2x128xf32>, vector<16x2x128xf32> -> vector<16x2x384xf32>
    %7 = vector.shape_cast %6 : vector<16x2x384xf32> to vector<32x384xf32>
    %c0_9 = arith.constant 0 : index
    %c0_10 = arith.constant 0 : index
    %c0_11 = arith.constant 0 : index
    %8 = vector.load %arg4[%c0_9, %c0_10, %c0_11] : memref<1x384x128xf32, #tpu.memory_space<vmem>>, vector<1x384x128xf32>
    %9 = vector.shape_cast %8 : vector<1x384x128xf32> to vector<384x128xf32>
    %cst = arith.constant dense<0.000000e+00> : vector<32x128xf32>
    %10 = tpu.matmul %7, %9, %cst {dimension_numbers = #tpu.dot_dimension_numbers<[1], [0], [0], [1], [0, 0, 1, 1], [], []>} : vector<32x384xf32>, vector<384x128xf32>, vector<32x128xf32> -> vector<32x128xf32>
    %c0_12 = arith.constant 0 : index
    %c0_13 = arith.constant 0 : index
    %c0_14 = arith.constant 0 : index
    %11 = vector.load %arg5[%c0_12, %c0_13, %c0_14] : memref<1x1x128xf32, #tpu.memory_space<vmem>>, vector<1x1x128xf32>
    %12 = vector.shape_cast %11 : vector<1x1x128xf32> to vector<1x128xf32>
    %13 = vector.broadcast %12 : vector<1x128xf32> to vector<32x128xf32>
    %14 = arith.addf %10, %13 : vector<32x128xf32>
    %15 = vector.shape_cast %14 : vector<32x128xf32> to vector<16x2x128xf32>
    %c0_15 = arith.constant 0 : index
    %c0_16 = arith.constant 0 : index
    %c0_17 = arith.constant 0 : index
    %c0_18 = arith.constant 0 : index
    %16 = vector.load %arg6[%c0_15, %c0_16, %c0_17, %c0_18] : memref<1x16x2x128xf32, #tpu.memory_space<vmem>>, vector<1x16x2x128xf32>
    %17 = vector.shape_cast %16 : vector<1x16x2x128xf32> to vector<16x2x128xf32>
    %18 = vector.shape_cast %15 : vector<16x2x128xf32> to vector<1x16x2x128xf32>
    tpu.vector_store %arg6[%c0_15, %c0_16, %c0_17, %c0_18], %18 {strides = array<i32>} : memref<1x16x2x128xf32, #tpu.memory_space<vmem>>, vector<1x16x2x128xf32>,
    return
  }
  func.func @transform_0(%arg0: i32, %arg1: i32, %arg2: i32) -> (i32, i32, i32, i32) {
    %c0_i32 = arith.constant 0 : i32
    %c0_i32_0 = arith.constant 0 : i32
    %c0_i32_1 = arith.constant 0 : i32
    return %arg0, %c0_i32, %arg1, %c0_i32_0 : i32, i32, i32, i32
  }
  func.func @transform_1(%arg0: i32, %arg1: i32, %arg2: i32) -> (i32, i32, i32) {
    %c0_i32 = arith.constant 0 : i32
    %c0_i32_0 = arith.constant 0 : i32
    return %arg0, %c0_i32, %arg2 : i32, i32, i32
  }
  func.func @transform_2(%arg0: i32, %arg1: i32, %arg2: i32) -> (i32, i32, i32) {
    %c0_i32 = arith.constant 0 : i32
    %c0_i32_0 = arith.constant 0 : i32
    return %arg0, %c0_i32, %arg2 : i32, i32, i32
  }
  func.func @transform_3(%arg0: i32, %arg1: i32, %arg2: i32) -> (i32, i32, i32, i32) {
    %c0_i32 = arith.constant 0 : i32
    %c0_i32_0 = arith.constant 0 : i32
    return %arg0, %c0_i32, %arg1, %arg2 : i32, i32, i32, i32
  }
}

</mosaic_0001>

<bundles_post_ra>
// kernel: tpu_custom_call.1
= control target key start
LH: loop header
LB: loop body
LE: loop exit
PB: predicated region body
PF: predicated region fallthrough
CT: control target
= control target key end

     0   :  { %s2056_s0 = inlined_call_operand.hbm [shape: f32[2,18,2,128], index: 0, kind: input, shape index: {}]   ;;  %s2057_s1 = inlined_call_operand.hbm [shape: f32[2,384,128], index: 1, kind: input, shape index: {}]   ;;  %s2058_s2 = inlined_call_operand.vmem [shape: f32[2,1,128], index: 2, kind: input, shape index: {}]   ;;  %s2059_s3 = inlined_call_operand.hbm [shape: f32[2,16,2,128], index: 3, kind: output, shape index: {}]  }
   0x1   :  { %2060 = sst [smem:[#allocation11_spill]] %s2056_s0 }
   0x2   :  { %8 = vsyncpa [#allocation3], 0 }
   0x3   :  { %10 = vsyncpa [#allocation3 + $0x1], 0 }
   0x4   :  { %11 = vsyncpa [#allocation6], 0 }
   0x5   :  { %13 = vsyncpa [#allocation6 + $0x1], 0 }
   0x6   :  { %14 = vsyncpa [#allocation4], 0 }
   0x7   :  { %16 = vsyncpa [#allocation4 + $0x1], 0  ;;  %s1701_s12 = smov 0   ;;  %s1703_s13 = smov 0  }
   0x8   :  { %s1705_s14 = smov 0   ;;  %s1707_s15 = smov 0  }
   0x9   :  { %s1709_s16 = smov 0   ;;  %s1711_s17 = smov 0  }
   0xa LB: > { %s1260_s18 = sadd.s32 4294967295, %s1669_s17   ;;  %s1261_s19 = sadd.s32 4294967294, %s1669_s17   ;;  %s1669_s17 = sphi %s1711_s17, %s22_s17   ;;  %s1665_s16 = sphi %s1709_s16, %s2072_s16   ;;  %s1661_s15 = sphi %s1707_s15, %s2071_s15   ;;  %s1657_s14 = sphi %s1705_s14, %s2070_s14   ;;  %s1653_s13 = sphi %s1703_s13, %s2069_s13   ;;  %s1649_s12 = sphi %s1701_s12, %s2068_s12  }
   0xb   : > { %s41_s20 = sadd.s32 1, %s1665_s16  ;;  %s50_s21 = sadd.s32 1, %s1657_s14 }
   0xc   : > { %p43_p0 = scmp.ge.s32.totalorder %s41_s20, 2  ;;  %p57_p1 = scmp.ne.s32.totalorder %s1657_s14, %s1653_s13 }
   0xd   : > { %p58_p2 = scmp.eq.s32.totalorder %s1669_s17, 0  ;;  %p63_p3 = scmp.ne.s32.totalorder %s1653_s13, %s1649_s12 }
   0xe   : > { %s2074_s20 = smov (%p43_p0, %s41_s20), 0  ;;  %p64_p5 = scmp.eq.s32.totalorder %s1260_s18, 0 }
   0xf   : > { %p1742_p4 = por %p58_p2, %p57_p1  ;;  %s45_s23 = ssub.s32 %s1665_s16, %s2074_s20 }
  0x10   : > { %p147_p6 = scmp.eq.s32.totalorder %s1260_s18, 1  ;;  %p48_p7 = scmp.eq.s32.totalorder %s45_s23, 0 }
  0x11   : > { %p1748_p8 = por %p64_p5, %p63_p3  ;;  %p153_p10 = scmp.eq.s32.totalorder %s1261_s19, 1 }
  0x12   : > { %p1752_p9 = por %p147_p6, %p57_p1  ;;  %p1263_p12 = scmp.ge.s32.totalorder %s1669_s17, 2 }
  0x13   : > { %s1757_s26 = scalar_select %p48_p7, %s1657_s14, %s50_s21  }
  0x14   : > { %p1759_p11 = por %p153_p10, %p63_p3  ;;  %p1472_p13 = scmp.lt.s32.totalorder %s1669_s17, 2 }
  0x15   : > { %s1766_s28 = sand.u32 1, %s1657_s14   ;;  %s1450_s30 = smul.u32 576, %s1665_s16 }
  0x16   : > { %s1449_s29 = smul.u32 36, %s1766_s28  ;;  %p1772_p0 = pnand %p1472_p13, %p1742_p4 }
  0x17   : > { %s2066_s0 = sld [smem:[#allocation11_spill]]  ;;  %p1266_p1 = scmp.ge.s32.totalorder %s1669_s17, 1 }
  0x18   : > { %s177_s8 = scalar_lea.vmem [#allocation2], %s1449_s29  ;;  %s174_s10 = scalar_lea.sflag [#allocation3], %s1766_s28 }
  0x19   : > { %s185_s9 = sshll.u32 %s177_s8, 4  ;;  %p1531_p2 = pneg %p1772_p0  ;;  %s186_s9 = int_to_ptr.vmem [resolvable:$true] %s185_s9 }
  0x1a   : > { %s1542_s11 = scalar_lea.vmem %s186_s9, 576  ;;  %s1671_s18 = smov [#allocation2]  }
  0x1b   : > { %p1543_p3 = scmp.ne.s32.totalorder %s186_s9, %s1542_s11  ;;  %s1547_s19 = sshll.u32 %s1671_s18, 4  ;;  %s1548_s19 = int_to_ptr.vmem [resolvable:$false] %s1547_s19 }
  0x1c   : > { %s1549_s21 = scalar_lea.vmem %s1548_s19, 1152  ;;  %p1550_p6 = scmp.lt.s32.totalorder %s186_s9, %s1548_s19 }
  0x1d   : > { %s184_s7 = scalar_lea.hbm %s2066_s0, %s1450_s30  ;;  %p1545_p4 = pnand %p1543_p3, %p1531_p2 }
  0x1e   : > { %p1551_p7 = scmp.lt.s32.totalorder %s1549_s21, %s1542_s11 }
  0x1f   : > { %p1546_p5 = pneg %p1545_p4 }
  0x20   : > { %p1552_p10 = por %p1551_p7, %p1550_p6 }
  0x22   : > { %p1553_p13 = pnand %p1552_p10, %p1546_p5 }
  0x24   : > { %1556 = shalt.err (!%p1553_p13)
}
  0x25   : > { %s1672_s22 = smov 32   ;;  %s1673_s23 = smov 2  }
  0x26   : > { %1464 = dma.hbm_to_vmem [thread:$0]  (!%p1772_p0), %s184_s7, 576, %s186_s9, %s174_s10, %s1672_s22, %s1672_s22, %s1673_s23  }
  0x27   : > { %p224_p3 = scmp.lt.s32.totalorder %s1669_s17, 3  ;;  %s1451_s29 = smul.u32 384, %s1766_s28 }
  0x28   : > { %s1452_s5 = smul.u32 6144, %s1665_s16  ;;  %s196_s21 = scalar_lea.sflag [#allocation6], %s1766_s28 }
  0x29   : > { %p1792_p4 = pnand %p1266_p1, %p224_p3  ;;  %s199_s18 = scalar_lea.vmem [#allocation5], %s1451_s29 }
  0x2a   : > { %s206_s11 = scalar_lea.hbm %s2057_s1, %s1452_s5  ;;  %s207_s19 = sshll.u32 %s199_s18, 4  ;;  %s208_s19 = int_to_ptr.vmem [resolvable:$true] %s207_s19 }
  0x2b   : > { %s1570_s0 = scalar_lea.vmem %s208_s19, 6144  ;;  %s1674_s7 = smov [#allocation5]  }
  0x2c   : > { %p1571_p5 = scmp.ne.s32.totalorder %s208_s19, %s1570_s0  ;;  %s1575_s9 = sshll.u32 %s1674_s7, 4  ;;  %s1576_s9 = int_to_ptr.vmem [resolvable:$false] %s1575_s9 }
  0x2d   : > { %s1577_s10 = scalar_lea.vmem %s1576_s9, 12288  ;;  %p1578_p1 = scmp.lt.s32.totalorder %s208_s19, %s1576_s9 }
  0x2e   : > { %p1573_p6 = pnand %p1571_p5, %p1531_p2  ;;  %p1579_p10 = scmp.lt.s32.totalorder %s1577_s10, %s1570_s0 }
  0x30   : > { %p1574_p7 = pneg %p1573_p6  ;;  %p1580_p13 = por %p1579_p10, %p1578_p1 }
  0x32   : > { %p1581_p3 = pnand %p1580_p13, %p1574_p7 }
  0x34   : > { %1584 = shalt.err (!%p1581_p3)
}
  0x35   : > { %s1675_s22 = smov 128   ;;  %s1676_s23 = smov 8  }
  0x36   : > { %1467 = dma.hbm_to_vmem [thread:$0]  (!%p1772_p0), %s206_s11, 6144, %s208_s19, %s196_s21, %s1675_s22, %s1675_s22, %s1676_s23  }
  0x37   : > { %228 = sbr.rel (%p1792_p4) target bundleno = 332 (0x14c), region = 32  ;;  %s1809_s28 = sand.u32 (!%p1792_p4), 1, %s1653_s13  }
  0x38   : > { %s1453_s29 = smul.u32 (!%p1792_p4), 36, %s1809_s28  ;;  %s231_s5 = scalar_lea.sflag (!%p1792_p4), [#allocation3], %s1809_s28 }
  0x3a   : > { %s1813_s0 = scalar_lea.vmem (!%p1792_p4), [#allocation2], %s1453_s29 }
  0x3c   : > { %1636 = dma.done.wait (%p1748_p8), %s231_s5, 576  }
  0x3d   : > { %1638 = vsyncadd (%p1748_p8), %s231_s5, 4294966720  ;;  %s1454_s4 = smul.u32 384, %s1809_s28  ;;  %s240_s30 = scalar_lea.sflag [#allocation6], %s1809_s28 }
  0x3f   : > { %s1821_s6 = scalar_lea.vmem [#allocation5], %s1454_s4 }
  0x40   : > { %1640 = dma.done.wait (%p1748_p8), %s240_s30, 6144  }
  0x41   : > { %1642 = vsyncadd (%p1748_p8), %s240_s30, 4294961152  ;;  %v668_v0 = vld [vmem:[%s1821_s6 + $0xf8] sm:$0xff]  ;;  %v667_v2 = vld [vmem:[%s1821_s6 + $0xf0] sm:$0xff]  ;;  %v1677_v15 = vmov 1983009808   ;;  %v385_v17 = vlaneseq  ;;  %p277_p8 = scmp.lt.s32.totalorder %s1661_s15, 1 }
  0x42   : > { %v652_v1 = vld [vmem:[%s1821_s6 + $0x78] sm:$0xff]  ;;  %1347 = vmatprep.subr.mxu0 %v668_v0  ;;  %v651_v3 = vld [vmem:[%s1821_s6 + $0x70] sm:$0xff]  ;;  %v666_v5 = vld [vmem:[%s1821_s6 + $0xe8] sm:$0xff]  ;;  %v383_v16 = vunpack.c.l.s4 %v1677_v15  ;;  %s1267_s19 = sshll.u32 %s1809_s28, 5  ;;  %s1346_s7 = sshll.u32 %s1661_s15, 9 }
  0x43   : > { %v684_v4 = vld [vmem:[%s1821_s6 + $0x178] sm:$0xff]  ;;  %1348 = vmatpush3.msra.mxu0 %v652_v1  ;;  %v683_v6 = vld [vmem:[%s1821_s6 + $0x170] sm:$0xff]  ;;  %v650_v7 = vld [vmem:[%s1821_s6 + $0x68] sm:$0xff]  ;;  %v386_v25 = vshrl.u32 %v385_v17, 7  ;;  %s278_s24 = scalar_select %p277_p8, %s1661_s15, 1 }
  0x44   : > { %1411 = vmatprep.subr.mxu1 %v684_v4  ;;  %1349 = vmatprep.subr.mxu0 %v667_v2  ;;  %v682_v8 = vld [vmem:[%s1821_s6 + $0x168] sm:$0xff]  ;;  %v665_v9 = vld [vmem:[%s1821_s6 + $0xe0] sm:$0xff]  ;;  %v664_v12 = vld [vmem:[%s1821_s6 + $0xd8] sm:$0xff]  ;;  %v384_v24 = vunpack.c.0.s8 %v383_v16  ;;  %s1976_s21 = scalar_lea.vmem [#allocation7], %s1267_s19  ;;  %s2004_s23 = scalar_lea.hbm %s2059_s3, %s1346_s7 }
  0x45   : > { %1412 = vmatpush3.msra.mxu1 %v684_v4  ;;  %1350 = vmatpush3.msra.mxu0 %v651_v3  ;;  %v649_v10 = vld [vmem:[%s1821_s6 + $0x60] sm:$0xff]  ;;  %v648_v13 = vld [vmem:[%s1821_s6 + $0x58] sm:$0xff]  ;;  %v663_v18 = vld [vmem:[%s1821_s6 + $0xd0] sm:$0xff]  ;;  %s282_s18 = scalar_lea.vmem %s2058_s2, %s278_s24  ;;  %s1134_s9 = sshll.u32 %s1976_s21, 4  ;;  %s2006_s9 = int_to_ptr.vmem [resolvable:$true] %s1134_s9 }
  0x46   : > { %1413 = vmatprep.subr.mxu1 %v683_v6  ;;  %1351 = vmatprep.subr.mxu0 %v666_v5  ;;  %v681_v11 = vld [vmem:[%s1821_s6 + $0x160] sm:$0xff]  ;;  %v680_v14 = vld [vmem:[%s1821_s6 + $0x158] sm:$0xff]  ;;  %v647_v19 = vld [vmem:[%s1821_s6 + $0x50] sm:$0xff]  ;;  %v1859_v37 = vsub.s32 %v384_v24, %v386_v25  ;;  %s1119_s15 = scalar_lea.sflag [#allocation4], %s1809_s28  ;;  %s1585_s29 = scalar_lea.vmem %s2006_s9, 512 }
  0x47   : > { %1414 = vmatpush3.msra.mxu1 %v683_v6  ;;  %1352 = vmatpush3.msra.mxu0 %v650_v7  ;;  %v679_v20 = vld [vmem:[%s1821_s6 + $0x150] sm:$0xff]  ;;  %v662_v21 = vld [vmem:[%s1821_s6 + $0xc8] sm:$0xff]  ;;  %v661_v26 = vld [vmem:[%s1821_s6 + $0xc0] sm:$0xff]  ;;  %p1586_p0 = scmp.ne.s32.totalorder %s2006_s9, %s1585_s29  ;;  %s1678_s5 = smov [#allocation7]  }
  0x48   : > { %1415 = vmatprep.subr.mxu1 %v682_v8  ;;  %1353 = vmatprep.subr.mxu0 %v665_v9  ;;  %v646_v22 = vld [vmem:[%s1821_s6 + $0x48] sm:$0xff]  ;;  %v645_v27 = vld [vmem:[%s1821_s6 + $0x40] sm:$0xff]  ;;  %v660_v28 = vld [vmem:[%s1821_s6 + $0xb8] sm:$0xff] }
  0x49   : > { %1416 = vmatpush3.msra.mxu1 %v682_v8  ;;  %1354 = vmatpush3.msra.mxu0 %v649_v10  ;;  %v678_v23 = vld [vmem:[%s1821_s6 + $0x148] sm:$0xff]  ;;  %v677_v29 = vld [vmem:[%s1821_s6 + $0x140] sm:$0xff]  ;;  %v644_v30 = vld [vmem:[%s1821_s6 + $0x38] sm:$0xff]  ;;  %p1587_p2 = pnand %p1586_p0, %p1752_p9 }
  0x4a   : > { %1417 = vmatprep.subr.mxu1 %v681_v11  ;;  %1355 = vmatprep.subr.mxu0 %v664_v12  ;;  %v659_v31 = vld [vmem:[%s1821_s6 + $0xb0] sm:$0xff]  ;;  %v676_v32 = vld [vmem:[%s1821_s6 + $0x138] sm:$0xff]  ;;  %v658_v38 = vld [vmem:[%s1821_s6 + $0xa8] sm:$0xff] }
  0x4b   : > { %1418 = vmatpush3.msra.mxu1 %v681_v11  ;;  %1356 = vmatpush3.msra.mxu0 %v648_v13  ;;  %v643_v33 = vld [vmem:[%s1821_s6 + $0x30] sm:$0xff]  ;;  %v283_v35 = vld [vmem:[%s1813_s0] sm:$0x3]  ;;  %v284_v36 = vld [vmem:[%s1813_s0 + $0x2] sm:$0x3]  ;;  %p1588_p4 = pneg %p1587_p2 }
  0x4c   : > { %1419 = vmatprep.subr.mxu1 %v680_v14  ;;  %1357 = vmatprep.subr.mxu0 %v663_v18  ;;  %v675_v34 = vld [vmem:[%s1821_s6 + $0x130] sm:$0xff]  ;;  %v285_v39 = vld [vmem:[%s1813_s0 + $0x4] sm:$0x3]  ;;  %v286_v40 = vld [vmem:[%s1813_s0 + $0x6] sm:$0x3] }
  0x4d   : > { %1420 = vmatpush3.msra.mxu1 %v680_v14  ;;  %1358 = vmatpush3.msra.mxu0 %v647_v19  ;;  %v1268_v41 = vld [vmem:[%s1813_s0 + $0x2] sm:$0x3]  ;;  %v642_v42 = vld [vmem:[%s1821_s6 + $0x28] sm:$0xff]  ;;  %v1269_v43 = vld [vmem:[%s1813_s0 + $0x4] sm:$0x3] }
  0x4e   : > { %1421 = vmatprep.subr.mxu1 %v679_v20  ;;  %1359 = vmatprep.subr.mxu0 %v662_v21  ;;  %v1270_v44 = vld [vmem:[%s1813_s0 + $0x6] sm:$0x3]  ;;  %v1271_v45 = vld [vmem:[%s1813_s0 + $0x8] sm:$0x3]  ;;  %v381_v46 = vcombine.low %v283_v35, %v1268_v41  ;;  %v674_v48 = vld [vmem:[%s1821_s6 + $0x128] sm:$0xff]  ;;  %v397_v49 = vcombine.low %v284_v36, %v1269_v43 }
  0x4f   : > { %1422 = vmatpush3.msra.mxu1 %v679_v20  ;;  %1360 = vmatpush3.msra.mxu0 %v646_v22  ;;  %v657_v47 = vld [vmem:[%s1821_s6 + $0xa0] sm:$0xff]  ;;  %v413_v50 = vcombine.low %v285_v39, %v1270_v44  ;;  %v429_v51 = vcombine.low %v286_v40, %v1271_v45  ;;  %v656_v59 = vld [vmem:[%s1821_s6 + $0x98] sm:$0xff]  ;;  %v1275_v2 = vld [vmem:[%s1813_s0 + $0x10] sm:$0x3] }
  0x50   : > { %1423 = vmatprep.subr.mxu1 %v678_v23  ;;  %1361 = vmatprep.subr.mxu0 %v661_v26  ;;  %v287_v52 = vld [vmem:[%s1813_s0 + $0x8] sm:$0x3]  ;;  %v388_v55 = vrot.slane %v381_v46, %v1859_v37  ;;  %v288_v56 = vld [vmem:[%s1813_s0 + $0xa] sm:$0x3]  ;;  %v289_v57 = vld [vmem:[%s1813_s0 + $0xc] sm:$0x3]  ;;  %v404_v60 = vrot.slane %v397_v49, %v1859_v37 }
  0x51   : > { %1424 = vmatpush3.msra.mxu1 %v678_v23  ;;  %1362 = vmatpush3.msra.mxu0 %v645_v27  ;;  %v641_v53 = vld [vmem:[%s1821_s6 + $0x20] sm:$0xff]  ;;  %v420_v61 = vrot.slane %v413_v50, %v1859_v37  ;;  %v436_v62 = vrot.slane %v429_v51, %v1859_v37  ;;  %v640_v7 = vld [vmem:[%s1821_s6 + $0x18] sm:$0xff]  ;;  %v655_v8 = vld [vmem:[%s1821_s6 + $0x90] sm:$0xff] }
  0x52   : > { %1425 = vmatprep.subr.mxu1 %v677_v29  ;;  %1363 = vmatprep.subr.mxu0 %v660_v28  ;;  %v673_v54 = vld [vmem:[%s1821_s6 + $0x120] sm:$0xff]  ;;  %v1317_v9 = vcombine.low %v388_v55, %v404_v60  ;;  %v639_v13 = vld [vmem:[%s1821_s6 + $0x10] sm:$0xff]  ;;  %v672_v14 = vld [vmem:[%s1821_s6 + $0x118] sm:$0xff] }
  0x53   : > { %1426 = vmatpush3.msra.mxu1 %v677_v29  ;;  %1364 = vmatpush3.msra.mxu0 %v644_v30  ;;  %v290_v58 = vld [vmem:[%s1813_s0 + $0xe] sm:$0x3]  ;;  %v1272_v63 = vld [vmem:[%s1813_s0 + $0xa] sm:$0x3]  ;;  %v1273_v0 = vld [vmem:[%s1813_s0 + $0xc] sm:$0x3]  ;;  %v1319_v10 = vcombine.low %v420_v61, %v436_v62 }
  0x54   : > { %1427 = vmatprep.subr.mxu1 %v676_v32  ;;  %1365 = vmatprep.subr.mxu0 %v659_v31  ;;  %v1274_v1 = vld [vmem:[%s1813_s0 + $0xe] sm:$0x3]  ;;  %v445_v3 = vcombine.low %v287_v52, %v1272_v63  ;;  %v461_v4 = vcombine.low %v288_v56, %v1273_v0  ;;  %v1300_v6 = vld.sshfl [vmem:[%s1813_s0 + $0x4] sm:$0x3 pattern:$0x76325410]  ;;  %v493_v11 = vcombine.low %v290_v58, %v1275_v2 }
  0x55   : > { %1428 = vmatpush3.msra.mxu1 %v676_v32  ;;  %1366 = vmatpush3.msra.mxu0 %v643_v33  ;;  %v477_v5 = vcombine.low %v289_v57, %v1274_v1  ;;  %v1301_v12 = vld.sshfl [vmem:[%s1813_s0 + $0x6] sm:$0x3 pattern:$0x76325410]  ;;  %v671_v15 = vld [vmem:[%s1821_s6 + $0x110] sm:$0xff]  ;;  %v654_v20 = vld [vmem:[%s1821_s6 + $0x88] sm:$0xff]  ;;  %v1899_v21 = vrot.slane %v1317_v9, %v1859_v37  ;;  %v1902_v22 = vrot.slane %v1319_v10, %v1859_v37 }
  0x56   : > { %1429 = vmatprep.subr.mxu1 %v675_v34  ;;  %1367 = vmatprep.subr.mxu0 %v658_v38  ;;  %v452_v16 = vrot.slane %v445_v3, %v1859_v37  ;;  %v468_v17 = vrot.slane %v461_v4, %v1859_v37  ;;  %v1302_v19 = vld.sshfl [vmem:[%s1813_s0 + $0x8] sm:$0x3 pattern:$0x76325410]  ;;  %v500_v23 = vrot.slane %v493_v11, %v1859_v37  ;;  %v291_v25 = vld [vmem:[%s1813_s0 + $0x10] sm:$0x3] }
  0x57   : > { %1430 = vmatpush3.msra.mxu1 %v675_v34  ;;  %1368 = vmatpush3.msra.mxu0 %v642_v42  ;;  %v484_v18 = vrot.slane %v477_v5, %v1859_v37  ;;  %v1303_v24 = vld.sshfl [vmem:[%s1813_s0 + $0xa] sm:$0x3 pattern:$0x76325410]  ;;  %v638_v26 = vld [vmem:[%s1821_s6 + $0x8] sm:$0xff]  ;;  %v1318_v28 = vcombine.low %v1300_v6, %v1301_v12  ;;  %v725_v33 = vcombine.high %v1899_v21, %v1902_v22 }
  0x58   : > { %1431 = vmatprep.subr.mxu1 %v674_v48  ;;  %1369 = vmatprep.subr.mxu0 %v657_v47  ;;  %v1321_v27 = vcombine.low %v452_v16, %v468_v17  ;;  %v1320_v29 = vcombine.low %v1302_v19, %v1303_v24  ;;  %v1304_v30 = vld.sshfl [vmem:[%s1813_s0 + $0xc] sm:$0x3 pattern:$0x76325410]  ;;  %v292_v31 = vld [vmem:[%s1813_s0 + $0x12] sm:$0x3]  ;;  %v724_v34 = vcombine.low %v1899_v21, %v1902_v22 }
  0x59   : > { %1432 = vmatpush3.msra.mxu1 %v674_v48  ;;  %1370 = vmatpush3.msra.mxu0 %v641_v53  ;;  %v653_v32 = vld [vmem:[%s1821_s6 + $0x80] sm:$0xff]  ;;  %v670_v35 = vld [vmem:[%s1821_s6 + $0x108] sm:$0xff]  ;;  %v1323_v36 = vcombine.low %v484_v18, %v500_v23  ;;  %v709_v42 = vrot.slane %v1318_v28, %v1859_v37  ;;  %v1279_v56 = vld [vmem:[%s1813_s0 + $0x18] sm:$0x3] }
  0x5a   : > { %1433 = vmatprep.subr.mxu1 %v673_v54  ;;  %1371 = vmatprep.subr.mxu0 %v656_v59  ;;  %v1305_v38 = vld.sshfl [vmem:[%s1813_s0 + $0xe] sm:$0x3 pattern:$0x76325410]  ;;  %v1276_v39 = vld [vmem:[%s1813_s0 + $0x12] sm:$0x3]  ;;  %v1920_v41 = vrot.slane %v1321_v27, %v1859_v37  ;;  %v723_v43 = vrot.slane %v1320_v29, %v1859_v37 }
  0x5b   : > { %1434 = vmatpush3.msra.mxu1 %v673_v54  ;;  %1372 = vmatpush3.msra.mxu0 %v640_v7  ;;  %v637_v40 = vld [vmem:[%s1821_s6] sm:$0xff]  ;;  %v1306_v44 = vld.sshfl [vmem:[%s1813_s0 + $0x10] sm:$0x3 pattern:$0x76325410]  ;;  %v751_v48 = vrot.slane %v1323_v36, %v1859_v37  ;;  %v1322_v50 = vcombine.low %v1304_v30, %v1305_v38  ;;  %v509_v52 = vcombine.low %v291_v25, %v1276_v39 }
  0x5c   : > { %1435 = vmatprep.subr.mxu1 %v672_v14  ;;  %1373 = vmatprep.subr.mxu0 %v655_v8  ;;  %v293_v45 = vld [vmem:[%s1813_s0 + $0x14] sm:$0x3]  ;;  %v669_v47 = vld [vmem:[%s1821_s6 + $0x100] sm:$0xff]  ;;  %v294_v51 = vld [vmem:[%s1813_s0 + $0x16] sm:$0x3]  ;;  %v726_v53 = vcombine.low %v709_v42, %v723_v43 }
  0x5d   : > { %1436 = vmatpush3.msra.mxu1 %v672_v14  ;;  %v1277_v46 = vld [vmem:[%s1813_s0 + $0x14] sm:$0x3]  ;;  %1374 = vmatpush3.msra.mxu0 %v639_v13  ;;  %v1307_v49 = vld.sshfl [vmem:[%s1813_s0 + $0x12] sm:$0x3 pattern:$0x76325410]  ;;  %v760_v59 = vcombine.high %v1920_v41, %v751_v48  ;;  %v759_v60 = vcombine.low %v1920_v41, %v751_v48  ;;  %v744_v61 = vrot.slane %v1322_v50, %v1859_v37 }
  0x5e   : > { %1437 = vmatprep.subr.mxu1 %v671_v15  ;;  %1375 = vmatprep.subr.mxu0 %v654_v20  ;;  %v1324_v54 = vcombine.low %v1306_v44, %v1307_v49  ;;  %v1278_v55 = vld [vmem:[%s1813_s0 + $0x16] sm:$0x3]  ;;  %v525_v57 = vcombine.low %v292_v31, %v1277_v46  ;;  %v295_v58 = vld [vmem:[%s1813_s0 + $0x18] sm:$0x3]  ;;  %v296_v62 = vld [vmem:[%s1813_s0 + $0x1a] sm:$0x3]  ;;  %v516_v2 = vrot.slane %v509_v52, %v1859_v37 }
  0x5f   : > { %908 = vmatprep.mubr.f32.mxu0 %v725_v33  ;;  %1376 = vmatpush3.msra.mxu0 %v638_v26  ;;  %v297_v63 = vld [vmem:[%s1813_s0 + $0x1c] sm:$0x3]  ;;  %v1280_v0 = vld [vmem:[%s1813_s0 + $0x1a] sm:$0x3]  ;;  %v298_v4 = vld [vmem:[%s1813_s0 + $0x1e] sm:$0x3]  ;;  %v541_v7 = vcombine.low %v293_v45, %v1278_v55  ;;  %v557_v8 = vcombine.low %v294_v51, %v1279_v56 }
  0x60   : > { %1438 = vmatpush3.msra.mxu1 %v671_v15  ;;  %1377 = vmatprep.subr.mxu0 %v653_v32  ;;  %v758_v1 = vrot.slane %v1324_v54, %v1859_v37  ;;  %v532_v3 = vrot.slane %v525_v57, %v1859_v37  ;;  %v1281_v5 = vld [vmem:[%s1813_s0 + $0x1c] sm:$0x3]  ;;  %v1282_v6 = vld [vmem:[%s1813_s0 + $0x1e] sm:$0x3]  ;;  %v1283_v9 = vld [vmem:[%s1813_s0 + $0x20] sm:$0x3]  ;;  %v573_v10 = vcombine.low %v295_v58, %v1280_v0 }
  0x61   : > { %1439 = vmatprep.subr.mxu1 %v670_v35  ;;  %1378 = vmatpush3.msra.mxu0 %v637_v40  ;;  %v1308_v11 = vld.sshfl [vmem:[%s1813_s0 + $0x14] sm:$0x3 pattern:$0x76325410]  ;;  %v589_v14 = vcombine.low %v296_v62, %v1281_v5  ;;  %v548_v16 = vrot.slane %v541_v7, %v1859_v37  ;;  %v564_v17 = vrot.slane %v557_v8, %v1859_v37  ;;  %v1316_v54 = vld [vmem:[%s282_s18] ss:$0 sm:$0xff] }
  0x62   : > { %1440 = vmatpush3.msra.mxu1 %v670_v35  ;;  %909 = vmatmul.mubr.f32.vlgmr.msra.gmra.mxu0 %v724_v34  ;;  %v761_v12 = vcombine.low %v744_v61, %v758_v1  ;;  %v1325_v13 = vcombine.low %v516_v2, %v532_v3  ;;  %v1309_v15 = vld.sshfl [vmem:[%s1813_s0 + $0x16] sm:$0x3 pattern:$0x76325410]  ;;  %v580_v18 = vrot.slane %v573_v10, %v1859_v37 }
  0x63   : > { %1441 = vmatprep.subr.mxu1 %v669_v47  ;;  %913 = vmatprep.mubr.f32.mxu0 %v760_v59  ;;  %v1310_v19 = vld.sshfl [vmem:[%s1813_s0 + $0x18] sm:$0x3 pattern:$0x76325410]  ;;  %v596_v20 = vrot.slane %v589_v14, %v1859_v37  ;;  %v605_v21 = vcombine.low %v297_v63, %v1282_v6  ;;  %v621_v22 = vcombine.low %v298_v4, %v1283_v9 }
  0x64   : > { %1442 = vmatpush3.msra.mxu1 %v669_v47  ;;  %1443 = vmatprep.mubr.f32.mxu1 %v726_v53  ;;  %v1311_v23 = vld.sshfl [vmem:[%s1813_s0 + $0x1a] sm:$0x3 pattern:$0x76325410]  ;;  %v1327_v24 = vcombine.low %v548_v16, %v564_v17  ;;  %v772_v25 = vrot.slane %v1325_v13, %v1859_v37  ;;  %v1326_v26 = vcombine.low %v1308_v11, %v1309_v15 }
  0x65   : > { %1444 = vmatmul.mubr.f32.vlgmr.msra.gmra.mxu1 %v761_v12  ;;  %v1328_v27 = vcombine.low %v1310_v19, %v1311_v23  ;;  %v1312_v28 = vld.sshfl [vmem:[%s1813_s0 + $0x1c] sm:$0x3 pattern:$0x76325410]  ;;  %v612_v29 = vrot.slane %v605_v21, %v1859_v37  ;;  %v628_v30 = vrot.slane %v621_v22, %v1859_v37  ;;  %v1329_v31 = vcombine.low %v580_v18, %v596_v20 }
  0x66   : > { %914 = vmatmul.mubr.f32.gmra.mxu0 %v759_v60  ;;  %v1313_v32 = vld.sshfl [vmem:[%s1813_s0 + $0x1e] sm:$0x3 pattern:$0x76325410]  ;;  %v786_v33 = vrot.slane %v1327_v24, %v1859_v37  ;;  %v779_v34 = vrot.slane %v1326_v26, %v1859_v37 }
  0x67   : > { %v793_v35 = vrot.slane %v1328_v27, %v1859_v37  ;;  %v1314_v36 = vld.sshfl [vmem:[%s1813_s0 + $0x20] sm:$0x3 pattern:$0x76325410]  ;;  %v1330_v38 = vcombine.low %v1312_v28, %v1313_v32  ;;  %v1331_v39 = vcombine.low %v612_v29, %v628_v30  ;;  %v807_v40 = vrot.slane %v1329_v31, %v1859_v37 }
  0x68   : > { %v1315_v41 = vld.sshfl [vmem:[%s1813_s0 + $0x22] sm:$0x3 pattern:$0x76325410]  ;;  %v795_v42 = vcombine.high %v772_v25, %v786_v33  ;;  %v794_v43 = vcombine.low %v772_v25, %v786_v33  ;;  %s1589_s0 = sshll.u32 %s1678_s5, 4  ;;  %s1590_s0 = int_to_ptr.vmem [resolvable:$false] %s1589_s0 }
  0x69   : > { %v796_v44 = vcombine.low %v779_v34, %v793_v35  ;;  %v1332_v45 = vcombine.low %v1314_v36, %v1315_v41  ;;  %v821_v46 = vrot.slane %v1331_v39, %v1859_v37  ;;  %v814_v47 = vrot.slane %v1330_v38, %v1859_v37  ;;  %s1591_s4 = scalar_lea.vmem %s1590_s0, 1024  ;;  %p1592_p5 = scmp.lt.s32.totalorder %s2006_s9, %s1590_s0 }
  0x6a   : > { %918 = vmatprep.mubr.f32.mxu0 %v795_v42  ;;  %p1593_p6 = scmp.lt.s32.totalorder %s1591_s4, %s1585_s29 }
  0x6b   : > { %1446 = vmatprep.mubr.f32.mxu1 %v796_v44  ;;  %v828_v48 = vrot.slane %v1332_v45, %v1859_v37  ;;  %919 = vmatmul.mubr.f32.gmra.mxu0 %v794_v43  ;;  %v830_v49 = vcombine.high %v807_v40, %v821_v46  ;;  %v829_v50 = vcombine.low %v807_v40, %v821_v46 }
  0x6c   : > { %p1594_p7 = por %p1593_p6, %p1592_p5 }
  0x6d   : > { %v831_v51 = vcombine.low %v814_v47, %v828_v48  ;;  %923 = vmatprep.mubr.f32.mxu0 %v830_v49 }
  0x6e   : > { %p1595_p1 = pnand %p1594_p7, %p1588_p4 }
  0x6f   : > { %1447 = vmatmul.mubr.f32.gmra.mxu1 %v831_v51  ;;  %924 = vmatmul.mubr.f32.gmra.mxu0 %v829_v50 }
 0x122   : > { %v1379_v52 = vpop.f32.mrf.mxu0 }
 0x124   : > { %v1380_v53 = vpop.f32.mrf.mxu0 }
 0x125   : > { %v1381_v55 = vadd.f32 %v1380_v53, %v1379_v52  ;;  %v1445_v56 = vpop.f32.mrf.mxu1 }
 0x126   : > { %v1382_v57 = vpop.f32.mrf.mxu0 }
 0x127   : > { %v911_v58 = vadd.f32 %v1381_v55, %v1316_v54  ;;  %v995_v59 = vpop.f32.mrf.mxu1 }
 0x128   : > { %v1383_v60 = vpop.f32.mrf.mxu0 }
 0x129   : > { %v1384_v61 = vadd.f32 %v1383_v60, %v1382_v57  ;;  %v996_v62 = vadd.f32 %v995_v59, %v911_v58 }
 0x12b   : > { %v916_v63 = vadd.f32 %v1384_v61, %v1316_v54  ;;  %v1018_v0 = vcombine.high %v996_v62, %v996_v62  ;;  %v1025_v1 = vrot.slane %v996_v62, %v1859_v37  ;;  %1333 = vst.sshfl [vmem:[%s1976_s21] sm:$0x3 pattern:$0x76325410] %v996_v62  ;;  %v1385_v2 = vpop.f32.mrf.mxu0 }
 0x12d   : > { %v1001_v3 = vadd.f32 %v1445_v56, %v916_v63  ;;  %v1032_v4 = vrot.slane %v1018_v0, %v1859_v37  ;;  %v1033_v5 = vcombine.high %v1025_v1, %v1025_v1  ;;  %1334 = vst.sshfl [vmem:[%s1976_s21 + $0x4] sm:$0x3 pattern:$0x76325410] %v1018_v0  ;;  %v1386_v6 = vpop.f32.mrf.mxu0 }
 0x12e   : > { %v1387_v10 = vadd.f32 %v1386_v6, %v1385_v2 }
 0x12f   : > { %v1035_v7 = vcombine.high %v1001_v3, %v1001_v3  ;;  %v1042_v8 = vrot.slane %v1001_v3, %v1859_v37  ;;  %1335 = vst.sshfl [vmem:[%s1976_s21 + $0x8] sm:$0x3 pattern:$0x76325410] %v1001_v3  ;;  %v1034_v9 = vcombine.high %v1032_v4, %v1032_v4  ;;  %1103 = vst [vmem:[%s1976_s21 + $0x2] sm:$0x3] %v1033_v5  ;;  %v1448_v11 = vpop.f32.mrf.mxu1  ;;  %v1388_v12 = vpop.f32.mrf.mxu0 }
 0x130   : > { %v921_v15 = vadd.f32 %v1387_v10, %v1316_v54 }
 0x131   : > { %v1049_v13 = vrot.slane %v1035_v7, %v1859_v37  ;;  %v1050_v14 = vcombine.high %v1042_v8, %v1042_v8  ;;  %1336 = vst.sshfl [vmem:[%s1976_s21 + $0xc] sm:$0x3 pattern:$0x76325410] %v1035_v7  ;;  %1105 = vst [vmem:[%s1976_s21 + $0x6] sm:$0x3] %v1034_v9  ;;  %v1005_v16 = vpop.f32.mrf.mxu1  ;;  %v1389_v17 = vpop.f32.mrf.mxu0 }
 0x132   : > { %v1390_v19 = vadd.f32 %v1389_v17, %v1388_v12  ;;  %v1006_v20 = vadd.f32 %v1005_v16, %v921_v15 }
 0x133   : > { %v1051_v18 = vcombine.high %v1049_v13, %v1049_v13  ;;  %1107 = vst [vmem:[%s1976_s21 + $0xa] sm:$0x3] %v1050_v14 }
 0x134   : > { %v926_v21 = vadd.f32 %v1390_v19, %v1316_v54  ;;  %v1052_v22 = vcombine.high %v1006_v20, %v1006_v20  ;;  %v1059_v23 = vrot.slane %v1006_v20, %v1859_v37  ;;  %1337 = vst.sshfl [vmem:[%s1976_s21 + $0x10] sm:$0x3 pattern:$0x76325410] %v1006_v20 }
 0x135   : > { %1109 = vst [vmem:[%s1976_s21 + $0xe] sm:$0x3] %v1051_v18 }
 0x136   : > { %v1011_v24 = vadd.f32 %v1448_v11, %v926_v21  ;;  %v1066_v25 = vrot.slane %v1052_v22, %v1859_v37  ;;  %v1067_v26 = vcombine.high %v1059_v23, %v1059_v23  ;;  %1338 = vst.sshfl [vmem:[%s1976_s21 + $0x14] sm:$0x3 pattern:$0x76325410] %v1052_v22 }
 0x138   : > { %v1069_v27 = vcombine.high %v1011_v24, %v1011_v24  ;;  %v1076_v28 = vrot.slane %v1011_v24, %v1859_v37  ;;  %1339 = vst.sshfl [vmem:[%s1976_s21 + $0x18] sm:$0x3 pattern:$0x76325410] %v1011_v24  ;;  %v1068_v29 = vcombine.high %v1066_v25, %v1066_v25  ;;  %1111 = vst [vmem:[%s1976_s21 + $0x12] sm:$0x3] %v1067_v26 }
 0x13a   : > { %v1083_v30 = vrot.slane %v1069_v27, %v1859_v37  ;;  %v1084_v31 = vcombine.high %v1076_v28, %v1076_v28  ;;  %1340 = vst.sshfl [vmem:[%s1976_s21 + $0x1c] sm:$0x3 pattern:$0x76325410] %v1069_v27  ;;  %1113 = vst [vmem:[%s1976_s21 + $0x16] sm:$0x3] %v1068_v29 }
 0x13c   : > { %v1085_v32 = vcombine.high %v1083_v30, %v1083_v30  ;;  %1115 = vst [vmem:[%s1976_s21 + $0x1a] sm:$0x3] %v1084_v31 }
 0x13e   : > { %1117 = vst [vmem:[%s1976_s21 + $0x1e] sm:$0x3] %v1085_v32 }
 0x13f   : > { %1598 = shalt.err (!%p1595_p1)
}
 0x140   : > { %s1599_s30 = scalar_lea.hbm %s2004_s23, 512  ;;  %s1603_s8 = scalar_lea.hbm %s2059_s3, 1024 }
 0x141   : > { %p1600_p10 = scmp.ne.s32.totalorder %s2004_s23, %s1599_s30  ;;  %p1604_p8 = scmp.lt.s32.totalorder %s2004_s23, %s2059_s3 }
 0x142   : > { %p1605_p0 = scmp.lt.s32.totalorder %s1603_s8, %s1599_s30 }
 0x143   : > { %p1601_p13 = pnand %p1600_p10, %p1752_p9 }
 0x144   : > { %p1606_p2 = por %p1605_p0, %p1604_p8 }
 0x145   : > { %p1602_p3 = pneg %p1601_p13 }
 0x147   : > { %p1607_p4 = pnand %p1606_p2, %p1602_p3 }
 0x149   : > { %1610 = shalt.err (!%p1607_p4)
}
 0x14a   : > { %s1679_s19 = smov 32   ;;  %s1680_s21 = smov 2  }
 0x14b   : > { %1459 = dma.vmem_to_hbm [thread:$0]  (%p1752_p9), %s2006_s9, 512, %s2004_s23, %s1119_s15, %s1679_s19, %s1679_s19, %s1680_s21  }
 0x14c PF: > { %s1149_s7 = sand.u32 1, %s1649_s12   ;;  %p1469_p5 = pnand %p1263_p12, %p1759_p11 }
 0x14d   : > { %s1150_s10 = scalar_lea.sflag [#allocation4], %s1149_s7 }
 0x14e   : > { %p1470_p6 = pneg %p1469_p5 }
 0x150   : > { %1644 = dma.done.wait (%p1470_p6), %s1150_s10, 512  }
 0x151   : > { %1646 = vsyncadd (%p1470_p6), %s1150_s10, 4294966784  ;;  %s22_s17 = sadd.s32 1, %s1669_s17   ;;  %s2068_s12 = smov %s1653_s13 }
 0x152   : > { %p19_p7 = scmp.ge.s32.totalorder %s22_s17, 4   ;;  %s2069_s13 = smov %s1657_s14 }
 0x153   : > { %s2070_s14 = smov %s1757_s26  ;;  %s2071_s15 = smov %s1665_s16 }
 0x154   : > { %s2072_s16 = smov %s2074_s20  ;;  %21 = sbr.rel (!%p19_p7) target bundleno = 10 (0xa), region = 95 }
 0x159   :  { %1155 = vsyncpa [#allocation3], 1 }
 0x15a   :  { %1157 = vsyncpa [#allocation3 + $0x1], 1 }
 0x15b   :  { %1158 = vsyncpa [#allocation6], 1 }
 0x15c   :  { %1160 = vsyncpa [#allocation6 + $0x1], 1 }
 0x15d   :  { %1161 = vsyncpa [#allocation4], 1 }
 0x15e   :  { %1163 = vsyncpa [#allocation4 + $0x1], 1 }

</bundles_post_ra>
